<compile_context>
chip_gen: v6e
topology: v6e:2x2x1
jax: 0.10.0
libtpu: 0.0.40
codegen_flags: <defaults>
</compile_context>

<pallas_src>
import functools
import math

import jax
import jax.numpy as jnp
from jax import lax
from jax.experimental import pallas as pl
from jax.experimental.pallas import tpu as pltpu


_MASK_VALUE = -0.7 * float(jnp.finfo(jnp.float32).max)


def _flash_kernel(q_ref, k_ref, v_ref, o_ref, m_ref, l_ref, acc_ref,
                  *, scale, n_valid, tk, needs_mask):
    # q_ref: (Kd, TQ)  query tile   (channel-major: queries on lanes)
    # k_ref: (Kd, TK)  current key tile
    # v_ref: (Vd, TK)  current value tile
    # o_ref: (Vd, TQ)  output tile (written once, at the last key step)
    # m_ref, l_ref: (1, TQ) running max / running softmax denom (f32)
    # acc_ref: (Vd, TQ) running un-normalized output (f32)
    kv = pl.program_id(1)

    @pl.when(kv == 0)
    def _init():
        m_ref[...] = jnp.full(m_ref.shape, _MASK_VALUE, jnp.float32)
        l_ref[...] = jnp.zeros(l_ref.shape, jnp.float32)
        acc_ref[...] = jnp.zeros(acc_ref.shape, jnp.float32)

    # Fold 1/sqrt(key_size) into the (tiny, Kd x TQ) query tile instead of the
    # full score tile.
    q = q_ref[...] * scale                           # (Kd, TQ)
    k = k_ref[...]                                   # (Kd, TK)

    # Scores with keys on sublanes and queries on lanes: contract the feature
    # axis of both operands directly -- no materialized K transpose.
    s = lax.dot_general(k, q, (((0,), (0,)), ((), ())),
                        preferred_element_type=jnp.float32)      # (TK, TQ)

    if needs_mask:  # statically removed when N divides the tiling
        key_ids = kv * tk + lax.broadcasted_iota(jnp.int32, s.shape, 0)
        s = jnp.where(key_ids < n_valid, s, _MASK_VALUE)

    m_prev = m_ref[...]                               # (1, TQ)
    m_cur = jnp.max(s, axis=0, keepdims=True)         # (1, TQ)  sublane reduce
    m_new = jnp.maximum(m_prev, m_cur)

    alpha = jnp.exp(m_prev - m_new)                   # (1, TQ)
    p = jnp.exp(s - m_new)                            # (TK, TQ)

    l_ref[...] = alpha * l_ref[...] + jnp.sum(p, axis=0, keepdims=True)
    acc_ref[...] = alpha * acc_ref[...] + jnp.dot(
        v_ref[...], p.astype(v_ref.dtype), preferred_element_type=jnp.float32)
    m_ref[...] = m_new

    @pl.when(kv == pl.num_programs(1) - 1)
    def _finalize():
        # Deferred normalization: scale only the (Vd, TQ) accumulator.
        inv_l = pl.reciprocal(l_ref[...], approx=True)            # (1, TQ)
        o_ref[...] = (acc_ref[...] * inv_l).astype(o_ref.dtype)


def _round_up(x, m):
    return ((x + m - 1) // m) * m


def _attention_pallas(q, k, v, key_size, *, tq=128, tk=256):
    # q, k: (Kd, N) channel-major; v: (Vd, N).  Returns (Vd, N).
    kdim, n = q.shape
    vdim = v.shape[0]
    scale = 1.0 / math.sqrt(key_size)

    # Pad N so both tilings divide it; padded keys are masked in-kernel and
    # padded query columns are sliced off afterwards (no hard assert on N).
    step = tq * tk // math.gcd(tq, tk)
    npad = _round_up(n, step)
    if npad != n:
        pad = npad - n
        q = jnp.pad(q, ((0, 0), (0, pad)))
        k = jnp.pad(k, ((0, 0), (0, pad)))
        v = jnp.pad(v, ((0, 0), (0, pad)))

    kernel = functools.partial(
        _flash_kernel, scale=scale, n_valid=n, tk=tk, needs_mask=(npad != n))

    out = pl.pallas_call(
        kernel,
        out_shape=jax.ShapeDtypeStruct((vdim, npad), q.dtype),
        grid_spec=pltpu.PrefetchScalarGridSpec(
            num_scalar_prefetch=0,
            grid=(npad // tq, npad // tk),          # (query tiles, key tiles)
            in_specs=[
                pl.BlockSpec((kdim, tq), lambda i, j: (0, i)),   # query tile
                pl.BlockSpec((kdim, tk), lambda i, j: (0, j)),   # key tile
                pl.BlockSpec((vdim, tk), lambda i, j: (0, j)),   # value tile
            ],
            out_specs=pl.BlockSpec((vdim, tq), lambda i, j: (0, i)),
            scratch_shapes=[
                pltpu.VMEM((1, tq), jnp.float32),        # running max
                pltpu.VMEM((1, tq), jnp.float32),        # running denom
                pltpu.VMEM((vdim, tq), jnp.float32),     # running output acc
            ],
        ),
        compiler_params=pltpu.CompilerParams(
            dimension_semantics=("parallel", "arbitrary"),
        ),
    )(q, k, v)
    return out[:, :n]


def conv_attention_forward(x, key_size, value_size, *, tq=128, tk=256):
    """x: (B, C, H, W) with C = value_size + 2*key_size -> (B, value_size, H, W)."""
    b, c, h, w = x.shape
    assert c == value_size + 2 * key_size
    hw = h * w
    n = b * hw

    # Single leading-axis transpose to channel-major (HW lane layout preserved),
    # then cheap channel-row slices -- replaces three lane-hostile Ci<->HW
    # transposes of the previous version.
    x_cm = jnp.transpose(x.reshape(b, c, hw), (1, 0, 2)).reshape(c, n)   # (C, N)
    v_cm = x_cm[:value_size]                                  # (Vd, N)
    k_cm = x_cm[value_size:value_size + key_size]             # (Kd, N)
    q_cm = x_cm[value_size + key_size:]                       # (Kd, N)

    o_cm = _attention_pallas(q_cm, k_cm, v_cm, key_size, tq=tq, tk=tk)   # (Vd, N)

    return jnp.transpose(o_cm.reshape(value_size, b, hw), (1, 0, 2)).reshape(
        b, value_size, h, w)


def _reference(x, key_size, value_size):
    # Pure-JAX mirror of the PyTorch forward, for sanity checking.
    b, c, h, w = x.shape
    hw = h * w
    splits = (x[:, :value_size],
              x[:, value_size:value_size + key_size],
              x[:, value_size + key_size:])

    def to_rows(t):
        ci = t.shape[1]
        return jnp.transpose(t.reshape(b, ci, hw), (0, 2, 1)).reshape(b * hw, ci)

    v_mat, k_mat, q_mat = (to_rows(t) for t in splits)
    weight = (q_mat @ k_mat.T) / math.sqrt(key_size)
    attn = jax.nn.softmax(weight, axis=1) @ v_mat
    return jnp.transpose(attn.reshape(b, hw, value_size), (0, 2, 1)).reshape(
        b, value_size, h, w)


if __name__ == "__main__":
    key_size = 8
    value_size = 8
    c = value_size + 2 * key_size   # 24

    # Case 1: N = B*H*W divisible by the tiles (no padding / masking path).
    b, h, w = 2, 16, 16
    x = jax.random.normal(jax.random.PRNGKey(0), (b, c, h, w), dtype=jnp.float32)
    out = jax.block_until_ready(conv_attention_forward(x, key_size, value_size))
    ref = _reference(x, key_size, value_size)
    assert out.shape == (b, value_size, h, w)
    # approx reciprocal + re-ordered (flash) accumulation => relaxed tolerance
    assert jnp.allclose(out, ref, atol=2e-2, rtol=2e-2), "mismatch (divisible N)"

    # Case 2: N not divisible by the tiles (exercises padding + in-kernel key mask).
    b2, h2, w2 = 1, 10, 10
    x2 = jax.random.normal(jax.random.PRNGKey(1), (b2, c, h2, w2), dtype=jnp.float32)
    out2 = jax.block_until_ready(conv_attention_forward(x2, key_size, value_size))
    ref2 = _reference(x2, key_size, value_size)
    assert out2.shape == (b2, value_size, h2, w2)
    assert jnp.allclose(out2, ref2, atol=2e-2, rtol=2e-2), "mismatch (padded N)"

    print("KERNEL_OK")
</pallas_src>

<mosaic_0001>
module attributes {stable_mosaic.version = 11 : i64} {
  func.func @_flash_kernel(%arg0: i32, %arg1: i32, %arg2: memref<8x128xf32, #tpu.memory_space<vmem>>, %arg3: memref<8x256xf32, #tpu.memory_space<vmem>>, %arg4: memref<8x256xf32, #tpu.memory_space<vmem>>, %arg5: memref<8x128xf32, #tpu.memory_space<vmem>>, %arg6: memref<1x128xf32, #tpu.memory_space<vmem>>, %arg7: memref<1x128xf32, #tpu.memory_space<vmem>>, %arg8: memref<8x128xf32, #tpu.memory_space<vmem>>) attributes {dimension_semantics = [#tpu.dimension_semantics<parallel>, #tpu.dimension_semantics<arbitrary>], iteration_bounds = array<i64: 4, 2>, scalar_prefetch = 0 : i64, scratch_operands = 3 : i64, tpu.core_type = #tpu.core_type<tc>, window_params = [{transform_indices = @transform_0, window_bounds = array<i64: 8, 128>}, {transform_indices = @transform_1, window_bounds = array<i64: 8, 256>}, {transform_indices = @transform_2, window_bounds = array<i64: 8, 256>}, {transform_indices = @transform_3, window_bounds = array<i64: 8, 128>}]} {
    %c0_i32 = arith.constant 0 : i32
    %0 = arith.cmpi eq, %arg1, %c0_i32 : i32
    %1 = arith.extui %0 : i1 to i32
    %c0_i32_0 = arith.constant 0 : i32
    %2 = arith.cmpi ne, %1, %c0_i32_0 : i32
    scf.if %2 {
      %cst_23 = arith.constant -2.38197633E+38 : f32
      %34 = vector.broadcast %cst_23 : f32 to vector<1x128xf32>
      %c0_24 = arith.constant 0 : index
      %c0_25 = arith.constant 0 : index
      %35 = vector.load %arg6[%c0_24, %c0_25] : memref<1x128xf32, #tpu.memory_space<vmem>>, vector<1x128xf32>
      tpu.vector_store %arg6[%c0_24, %c0_25], %34 {strides = array<i32>} : memref<1x128xf32, #tpu.memory_space<vmem>>, vector<1x128xf32>,
      %cst_26 = arith.constant 0.000000e+00 : f32
      %36 = vector.broadcast %cst_26 : f32 to vector<1x128xf32>
      %c0_27 = arith.constant 0 : index
      %c0_28 = arith.constant 0 : index
      %37 = vector.load %arg7[%c0_27, %c0_28] : memref<1x128xf32, #tpu.memory_space<vmem>>, vector<1x128xf32>
      tpu.vector_store %arg7[%c0_27, %c0_28], %36 {strides = array<i32>} : memref<1x128xf32, #tpu.memory_space<vmem>>, vector<1x128xf32>,
      %cst_29 = arith.constant 0.000000e+00 : f32
      %38 = vector.broadcast %cst_29 : f32 to vector<8x128xf32>
      %c0_30 = arith.constant 0 : index
      %c0_31 = arith.constant 0 : index
      %39 = vector.load %arg8[%c0_30, %c0_31] : memref<8x128xf32, #tpu.memory_space<vmem>>, vector<8x128xf32>
      tpu.vector_store %arg8[%c0_30, %c0_31], %38 {strides = array<i32>} : memref<8x128xf32, #tpu.memory_space<vmem>>, vector<8x128xf32>,
    } else {
    }
    %c0 = arith.constant 0 : index
    %c0_1 = arith.constant 0 : index
    %3 = vector.load %arg2[%c0, %c0_1] : memref<8x128xf32, #tpu.memory_space<vmem>>, vector<8x128xf32>
    %cst = arith.constant 0.353553385 : f32
    %4 = vector.broadcast %cst : f32 to vector<8x128xf32>
    %5 = arith.mulf %3, %4 : vector<8x128xf32>
    %c0_2 = arith.constant 0 : index
    %c0_3 = arith.constant 0 : index
    %6 = vector.load %arg3[%c0_2, %c0_3] : memref<8x256xf32, #tpu.memory_space<vmem>>, vector<8x256xf32>
    %cst_4 = arith.constant dense<0.000000e+00> : vector<256x128xf32>
    %7 = tpu.matmul %6, %5, %cst_4 {dimension_numbers = #tpu.dot_dimension_numbers<[0], [0], [1], [1], [0, 1, 1, 1], [], []>} : vector<8x256xf32>, vector<8x128xf32>, vector<256x128xf32> -> vector<256x128xf32>
    %c0_5 = arith.constant 0 : index
    %c0_6 = arith.constant 0 : index
    %8 = vector.load %arg6[%c0_5, %c0_6] : memref<1x128xf32, #tpu.memory_space<vmem>>, vector<1x128xf32>
    %cst_7 = arith.constant dense<0xFF800000> : vector<128xf32>
    %9 = vector.multi_reduction <maximumf>, %7, %cst_7 [0] : vector<256x128xf32> to vector<128xf32>
    %10 = vector.shape_cast %9 : vector<128xf32> to vector<1x128xf32>
    %11 = arith.maximumf %8, %10 : vector<1x128xf32>
    %12 = arith.subf %8, %11 : vector<1x128xf32>
    %13 = math.exp %12 : vector<1x128xf32>
    %14 = vector.broadcast %11 : vector<1x128xf32> to vector<256x128xf32>
    %15 = arith.subf %7, %14 : vector<256x128xf32>
    %16 = math.exp %15 : vector<256x128xf32>
    %c0_8 = arith.constant 0 : index
    %c0_9 = arith.constant 0 : index
    %17 = vector.load %arg7[%c0_8, %c0_9] : memref<1x128xf32, #tpu.memory_space<vmem>>, vector<1x128xf32>
    %18 = arith.mulf %13, %17 : vector<1x128xf32>
    %cst_10 = arith.constant dense<0.000000e+00> : vector<128xf32>
    %19 = vector.multi_reduction <add>, %16, %cst_10 [0] : vector<256x128xf32> to vector<128xf32>
    %20 = vector.shape_cast %19 : vector<128xf32> to vector<1x128xf32>
    %21 = arith.addf %18, %20 : vector<1x128xf32>
    %c0_11 = arith.constant 0 : index
    %c0_12 = arith.constant 0 : index
    %22 = vector.load %arg7[%c0_11, %c0_12] : memref<1x128xf32, #tpu.memory_space<vmem>>, vector<1x128xf32>
    tpu.vector_store %arg7[%c0_11, %c0_12], %21 {strides = array<i32>} : memref<1x128xf32, #tpu.memory_space<vmem>>, vector<1x128xf32>,
    %c0_13 = arith.constant 0 : index
    %c0_14 = arith.constant 0 : index
    %23 = vector.load %arg8[%c0_13, %c0_14] : memref<8x128xf32, #tpu.memory_space<vmem>>, vector<8x128xf32>
    %24 = vector.broadcast %13 : vector<1x128xf32> to vector<8x128xf32>
    %25 = arith.mulf %24, %23 : vector<8x128xf32>
    %c0_15 = arith.constant 0 : index
    %c0_16 = arith.constant 0 : index
    %26 = vector.load %arg4[%c0_15, %c0_16] : memref<8x256xf32, #tpu.memory_space<vmem>>, vector<8x256xf32>
    %cst_17 = arith.constant dense<0.000000e+00> : vector<8x128xf32>
    %27 = tpu.matmul %26, %16, %cst_17 {dimension_numbers = #tpu.dot_dimension_numbers<[1], [0], [0], [1], [0, 0, 1, 1], [], []>} : vector<8x256xf32>, vector<256x128xf32>, vector<8x128xf32> -> vector<8x128xf32>
    %28 = arith.addf %25, %27 : vector<8x128xf32>
    %c0_18 = arith.constant 0 : index
    %c0_19 = arith.constant 0 : index
    %29 = vector.load %arg8[%c0_18, %c0_19] : memref<8x128xf32, #tpu.memory_space<vmem>>, vector<8x128xf32>
    tpu.vector_store %arg8[%c0_18, %c0_19], %28 {strides = array<i32>} : memref<8x128xf32, #tpu.memory_space<vmem>>, vector<8x128xf32>,
    %c0_20 = arith.constant 0 : index
    %c0_21 = arith.constant 0 : index
    %30 = vector.load %arg6[%c0_20, %c0_21] : memref<1x128xf32, #tpu.memory_space<vmem>>, vector<1x128xf32>
    tpu.vector_store %arg6[%c0_20, %c0_21], %11 {strides = array<i32>} : memref<1x128xf32, #tpu.memory_space<vmem>>, vector<1x128xf32>,
    %c1_i32 = arith.constant 1 : i32
    %31 = arith.cmpi eq, %arg1, %c1_i32 : i32
    %32 = arith.extui %31 : i1 to i32
    %c0_i32_22 = arith.constant 0 : i32
    %33 = arith.cmpi ne, %32, %c0_i32_22 : i32
    scf.if %33 {
      %c0_23 = arith.constant 0 : index
      %c0_24 = arith.constant 0 : index
      %34 = vector.load %arg7[%c0_23, %c0_24] : memref<1x128xf32, #tpu.memory_space<vmem>>, vector<1x128xf32>
      %35 = tpu.reciprocal %34 {approx = true} : vector<1x128xf32> -> vector<1x128xf32>
      %c0_25 = arith.constant 0 : index
      %c0_26 = arith.constant 0 : index
      %36 = vector.load %arg8[%c0_25, %c0_26] : memref<8x128xf32, #tpu.memory_space<vmem>>, vector<8x128xf32>
      %37 = vector.broadcast %35 : vector<1x128xf32> to vector<8x128xf32>
      %38 = arith.mulf %36, %37 : vector<8x128xf32>
      %c0_27 = arith.constant 0 : index
      %c0_28 = arith.constant 0 : index
      %39 = vector.load %arg5[%c0_27, %c0_28] : memref<8x128xf32, #tpu.memory_space<vmem>>, vector<8x128xf32>
      tpu.vector_store %arg5[%c0_27, %c0_28], %38 {strides = array<i32>} : memref<8x128xf32, #tpu.memory_space<vmem>>, vector<8x128xf32>,
    } else {
    }
    return
  }
  func.func @transform_0(%arg0: i32, %arg1: i32) -> (i32, i32) {
    %c0_i32 = arith.constant 0 : i32
    %c0_i32_0 = arith.constant 0 : i32
    return %c0_i32, %arg0 : i32, i32
  }
  func.func @transform_1(%arg0: i32, %arg1: i32) -> (i32, i32) {
    %c0_i32 = arith.constant 0 : i32
    %c0_i32_0 = arith.constant 0 : i32
    return %c0_i32, %arg1 : i32, i32
  }
  func.func @transform_2(%arg0: i32, %arg1: i32) -> (i32, i32) {
    %c0_i32 = arith.constant 0 : i32
    %c0_i32_0 = arith.constant 0 : i32
    return %c0_i32, %arg1 : i32, i32
  }
  func.func @transform_3(%arg0: i32, %arg1: i32) -> (i32, i32) {
    %c0_i32 = arith.constant 0 : i32
    %c0_i32_0 = arith.constant 0 : i32
    return %c0_i32, %arg0 : i32, i32
  }
}

</mosaic_0001>

<bundles_post_ra>
// kernel: tpu_custom_call.1
= control target key start
LH: loop header
LB: loop body
LE: loop exit
PB: predicated region body
PF: predicated region fallthrough
CT: control target
= control target key end

     0   :  { %s2220_s0 = inlined_call_operand.hbm [shape: f32[8,512], index: 0, kind: input, shape index: {}]   ;;  %s2221_s1 = inlined_call_operand.hbm [shape: f32[8,512], index: 1, kind: input, shape index: {}]   ;;  %s2222_s2 = inlined_call_operand.hbm [shape: f32[8,512], index: 2, kind: input, shape index: {}]   ;;  %s2223_s3 = inlined_call_operand.hbm [shape: f32[8,512], index: 3, kind: output, shape index: {}]  }
   0x1   :  { %2234 = sst [smem:[#allocation23_spill]] %s2221_s1 }
   0x2   :  { %2235 = sst [smem:[#allocation24_spill]] %s2222_s2 }
   0x3   :  { %2236 = sst [smem:[#allocation25_spill]] %s2223_s3 }
   0x4   :  { %8 = vsyncpa [#allocation6], 0 }
   0x5   :  { %10 = vsyncpa [#allocation6 + $0x1], 0 }
   0x6   :  { %11 = vsyncpa [#allocation9], 0 }
   0x7   :  { %13 = vsyncpa [#allocation9 + $0x1], 0 }
   0x8   :  { %14 = vsyncpa [#allocation7], 0 }
   0x9   :  { %16 = vsyncpa [#allocation7 + $0x1], 0  ;;  %s1685_s12 = smov 0   ;;  %s1687_s13 = smov 0  }
   0xa   :  { %s1689_s14 = smov 0   ;;  %s1691_s15 = smov 0  }
   0xb   :  { %s1693_s16 = smov 0   ;;  %s1695_s17 = smov 0  }
   0xc   :  { %s1697_s18 = smov 0   ;;  %s1699_s19 = smov 0  }
   0xd   :  { %s1701_s20 = smov 0   ;;  %s1703_s21 = smov 0  }
   0xe   :  { %s1705_s22 = smov 0  }
   0xf LB: > { %2237 = sst [smem:[#allocation15_spill]] %s1625_s14  ;;  %s1739_s23 = sadd.s32 4294967295, %s1657_s22   ;;  %s1657_s22 = sphi %s1705_s22, %s22_s22   ;;  %s1653_s21 = sphi %s1703_s21, %s2268_s21   ;;  %s1649_s20 = sphi %s1701_s20, %s2267_s20   ;;  %s1645_s19 = sphi %s1699_s19, %s2266_s19   ;;  %s1641_s18 = sphi %s1697_s18, %s2265_s18   ;;  %s1637_s17 = sphi %s1695_s17, %s2273_s17   ;;  %s1633_s16 = sphi %s1693_s16, %s2272_s16   ;;  %s1629_s15 = sphi %s1691_s15, %s2271_s15   ;;  %s1625_s14 = sphi %s1689_s14, %s2264_s14   ;;  %s1621_s13 = sphi %s1687_s13, %s2270_s13   ;;  %s1617_s12 = sphi %s1685_s12, %s2269_s12  }
  0x10   : > { %2238 = sst [smem:[#allocation16_spill]] %s1629_s15  ;;  %s31_s24 = sadd.s32 1, %s1649_s20 }
  0x11   : > { %2239 = sst [smem:[#allocation17_spill]] %s1645_s19  ;;  %p1742_p0 = scmp.ge.s32.totalorder %s31_s24, 2 }
  0x12   : > { %2240 = sst [smem:[#allocation18_spill]] %s1649_s20  ;;  %p49_p1 = scmp.eq.s32.totalorder %s1657_s22, 0 }
  0x13   : > { %2241 = sst [smem:[#allocation19_spill]] %s1653_s21  ;;  %p55_p2 = scmp.eq.s32.totalorder %s1739_s23, 0 }
  0x14   : > { %s67_s26 = sadd.s32 1, %s1625_s14  ;;  %s2275_s24 = smov (%p1742_p0, %s31_s24), 0 }
  0x15   : > { %2243 = sst [smem:[#allocation20_spill]] %s2275_s24  ;;  %p74_p3 = scmp.ne.s32.totalorder %s1625_s14, %s1621_s13 }
  0x16   : > { %p80_p4 = scmp.ne.s32.totalorder %s1621_s13, %s1617_s12  ;;  %s64_s27 = ssub.s32 %s1649_s20, %s2275_s24 }
  0x17   : > { %p65_p5 = scmp.eq.s32.totalorder %s64_s27, 0  ;;  %p76_p6 = por %p74_p3, %p49_p1 }
  0x18   : > { %p1762_p7 = por %p80_p4, %p55_p2  ;;  %p2225_p8 = scmp.lt.s32.totalorder %s1657_s22, 8 }
  0x19   : > { %s1768_s29 = scalar_select %p65_p5, %s1625_s14, %s67_s26  }
  0x1a   : > { %s174_s30 = sand.u32 1, %s1657_s22   ;;  %s176_s4 = sand.u32 1, %s1625_s14  }
  0x1b   : > { %2245 = sst [smem:[#allocation21_spill]] %s1768_s29  ;;  %s1772_s5 = sshll.u32 %s176_s4, 4 }
  0x1c   : > { %s1146_s6 = sshll.u32 %s1649_s20, 8  ;;  %s2246_s1 = sld [smem:[#allocation23_spill]] }
  0x1d   : > { %s178_s10 = scalar_lea.vmem [#allocation8], %s1772_s5  ;;  %p1781_p9 = pnand %p2225_p8, %p76_p6 }
  0x1e   : > { %s186_s11 = sshll.u32 %s178_s10, 4  ;;  %s2248_s2 = sld [smem:[#allocation24_spill]]  ;;  %s187_s11 = int_to_ptr.vmem [resolvable:$true] %s186_s11 }
  0x1f   : > { %p1103_p10 = scmp.ge.s32.totalorder %s1657_s22, 1  ;;  %s1791_s24 = scalar_lea.sflag [#allocation9], %s174_s30 }
  0x20   : > { %p2226_p11 = pneg %p1781_p9  ;;  %s1462_s7 = scalar_lea.vmem %s187_s11, 256 }
  0x21   : > { %p1463_p12 = scmp.ne.s32.totalorder %s187_s11, %s1462_s7  ;;  %s1659_s8 = smov [#allocation8]  }
  0x22   : > { %s184_s9 = scalar_lea.hbm %s2246_s1, %s1146_s6  ;;  %s1467_s10 = sshll.u32 %s1659_s8, 4  ;;  %s1468_s10 = int_to_ptr.vmem [resolvable:$false] %s1467_s10 }
  0x23   : > { %p1465_p13 = pnand %p1463_p12, %p2226_p11  ;;  %s1469_s1 = scalar_lea.vmem %s1468_s10, 512 }
  0x24   : > { %s1788_s4 = scalar_lea.hbm %s2248_s2, %s1146_s6  ;;  %p1470_p4 = scmp.lt.s32.totalorder %s187_s11, %s1468_s10 }
  0x25   : > { %p1466_p3 = pneg %p1465_p13  ;;  %p1471_p5 = scmp.lt.s32.totalorder %s1469_s1, %s1462_s7 }
  0x27   : > { %p1472_p6 = por %p1471_p5, %p1470_p4 }
  0x29   : > { %p1473_p8 = pnand %p1472_p6, %p1466_p3 }
  0x2b   : > { %1476 = shalt.err (!%p1473_p8)
}
  0x2c   : > { %1280 = dma.hbm_to_vmem [thread:$0]  (!%p1781_p9), %s184_s9, 256, %s187_s11, %s1791_s24  }
  0x2d   : > { %p210_p8 = scmp.lt.s32.totalorder %s1657_s22, 9  ;;  %s1092_s30 = sadd.s32 4294967294, %s1657_s22  }
  0x2e   : > { %s34_s6 = sadd.s32 1, %s1653_s21  ;;  %s41_s26 = sadd.s32 1, %s1637_s17 }
  0x2f   : > { %p1804_p12 = pnand %p1103_p10, %p210_p8  ;;  %s2277_s6 = smov (!%p1742_p0, %s34_s6), %s1653_s21 }
  0x30   : > { %p48_p13 = scmp.ne.s32.totalorder %s1637_s17, %s1633_s16  ;;  %p36_p3 = scmp.ge.s32.totalorder %s2277_s6, 4 }
  0x31   : > { %p54_p4 = scmp.ne.s32.totalorder %s1633_s16, %s1629_s15  ;;  %p130_p10 = scmp.eq.s32.totalorder %s1739_s23, 7 }
  0x32   : > { %p1820_p5 = por %p49_p1, %p48_p13  ;;  %s2279_s6 = smov (%p36_p3, %s2277_s6), 0 }
  0x33   : > { %2251 = sst [smem:[#allocation22_spill]] %s2279_s6  ;;  %p1829_p6 = por %p55_p2, %p54_p4 }
  0x34   : > { %p1833_p0 = por %p130_p10, %p48_p13  ;;  %s38_s27 = ssub.s32 %s1653_s21, %s2279_s6 }
  0x35   : > { %p136_p1 = scmp.eq.s32.totalorder %s1092_s30, 7  ;;  %p39_p8 = scmp.eq.s32.totalorder %s38_s27, 0 }
  0x36   : > { %s2253_s11 = scalar_select %p1833_p0, 1, 0 }
  0x37   : > { %s156_s7 = sand.u32 1, %s1637_s17   ;;  %p1840_p11 = por %p136_p1, %p54_p4 }
  0x38   : > { %s1845_s10 = scalar_select %p39_p8, %s1637_s17, %s41_s26  }
  0x39   : > { %s2254_s8 = scalar_select %p1840_p11, 1, 0 }
  0x3a   : > { %s1095_s2 = sshll.u32 %s156_s7, 3  ;;  %s1096_s20 = sshll.u32 %s1653_s21, 7 }
  0x3b   : > { %s165_s15 = scalar_lea.hbm %s2220_s0, %s1096_s20  ;;  %s160_s3 = scalar_lea.vmem [#allocation5], %s1095_s2 }
  0x3c   : > { %s167_s19 = sshll.u32 %s160_s3, 4  ;;  %p2255_p2 = scmp.lt.s32.totalorder %s1657_s22, 8  ;;  %s168_s19 = int_to_ptr.vmem [resolvable:$true] %s167_s19 }
  0x3d   : > { %s197_s27 = scalar_lea.vmem [#allocation10], %s1772_s5  ;;  %s157_s26 = scalar_lea.sflag [#allocation6], %s156_s7 }
  0x3e   : > { %p1855_p13 = pnand %p2255_p2, %p1820_p5  ;;  %s205_s6 = sshll.u32 %s197_s27, 4  ;;  %s1860_s6 = int_to_ptr.vmem [resolvable:$true] %s205_s6 }
  0x3f   : > { %s1490_s21 = scalar_lea.vmem %s168_s19, 128  ;;  %s1660_s2 = smov [#allocation5]  }
  0x40   : > { %p1479_p3 = pneg %p1855_p13  ;;  %p1491_p4 = scmp.ne.s32.totalorder %s168_s19, %s1490_s21 }
  0x41   : > { %s1495_s3 = sshll.u32 %s1660_s2, 4  ;;  %s1496_s3 = int_to_ptr.vmem [resolvable:$false] %s1495_s3 }
  0x42   : > { %p1493_p10 = pnand %p1491_p4, %p1479_p3  ;;  %s1497_s14 = scalar_lea.vmem %s1496_s3, 256 }
  0x43   : > { %p1498_p5 = scmp.lt.s32.totalorder %s168_s19, %s1496_s3  ;;  %p1499_p8 = scmp.lt.s32.totalorder %s1497_s14, %s1490_s21 }
  0x44   : > { %p1494_p1 = pneg %p1493_p10 }
  0x45   : > { %p1500_p2 = por %p1499_p8, %p1498_p5 }
  0x47   : > { %p1501_p11 = pnand %p1500_p2, %p1494_p1 }
  0x49   : > { %1504 = shalt.err (!%p1501_p11)
}
  0x4a   : > { %1277 = dma.hbm_to_vmem [thread:$0]  (!%p1855_p13), %s165_s15, 128, %s168_s19, %s157_s26  }
  0x4b   : > { %s1518_s20 = scalar_lea.vmem %s1860_s6, 256  ;;  %p2257_p3 = pneg %p1781_p9 }
  0x4c   : > { %p1519_p0 = scmp.ne.s32.totalorder %s1860_s6, %s1518_s20  ;;  %s1661_s29 = smov [#allocation10]  }
  0x4d   : > { %s1523_s5 = sshll.u32 %s1661_s29, 4  ;;  %s1524_s5 = int_to_ptr.vmem [resolvable:$false] %s1523_s5 }
  0x4e   : > { %p1521_p4 = pnand %p1519_p0, %p2257_p3  ;;  %s1525_s21 = scalar_lea.vmem %s1524_s5, 512 }
  0x4f   : > { %p1526_p5 = scmp.lt.s32.totalorder %s1860_s6, %s1524_s5  ;;  %p1527_p1 = scmp.lt.s32.totalorder %s1525_s21, %s1518_s20 }
  0x50   : > { %p1522_p10 = pneg %p1521_p4 }
  0x51   : > { %p1528_p11 = por %p1527_p1, %p1526_p5 }
  0x53   : > { %p1529_p8 = pnand %p1528_p11, %p1522_p10 }
  0x55   : > { %1532 = shalt.err (!%p1529_p8)
}
  0x56   : > { %1283 = dma.hbm_to_vmem [thread:$0]  (!%p1781_p9), %s1788_s4, 256, %s1860_s6, %s1791_s24  }
  0x57   : > { %214 = sbr.rel (%p1804_p12) target bundleno = 888 (0x378), region = 32  ;;  %s1880_s15 = sand.u32 (!%p1804_p12), 1, %s1633_s16  }
  0x58   : > { %s1104_s19 = sshll.u32 (!%p1804_p12), %s1880_s15, 3  ;;  %s217_s9 = scalar_lea.sflag (!%p1804_p12), [#allocation6], %s1880_s15 }
  0x59   : > { %s220_s7 = scalar_lea.vmem (!%p1804_p12), [#allocation5], %s1104_s19 }
  0x5c   : > { %1604 = dma.done.wait (%p1829_p6), %s217_s9, 128  }
  0x5d   : > { %1606 = vsyncadd (%p1829_p6), %s217_s9, 4294967168  ;;  %s225_s24 = sand.u32 1, %s1739_s23   ;;  %s227_s12 = sand.u32 1, %s1621_s13  }
  0x5e   : > { %s1890_s4 = sshll.u32 %s227_s12, 4  ;;  %s226_s1 = scalar_lea.sflag [#allocation9], %s225_s24 }
  0x5f   : > { %s229_s6 = scalar_lea.vmem [#allocation8], %s1890_s4 }
  0x60   : > { %1608 = dma.done.wait (%p1762_p7), %s226_s1, 512  }
  0x61   : > { %1610 = vsyncadd (%p1762_p7), %s226_s1, 4294966784  ;;  %s238_s30 = scalar_lea.vmem [#allocation10], %s1890_s4  ;;  %s1898_s27 = scalar_lea.vmem [#allocation11], %s1104_s19 }
  0x62   : > { %p1108_p9 = scmp.ne.s32.totalorder %s1641_s18, 0 }
  0x64   : > { %276 = sbr.rel (%p1108_p9) target bundleno = 108 (0x6c), region = 48 }
  0x69   : > { %v1662_v0 = vmov -2.3819763e+38   ;;  %v1663_v1 = vmov 0.0  }
  0x6a   : > { %277 = vst [vmem:[#allocation2] sm:$0x1] %v1662_v0  ;;  %278 = vst [vmem:[#allocation3] sm:$0x1] %v1663_v1 }
  0x6b   : > { %279 = vst [vmem:[#allocation4] sm:$0xff] %v1663_v1 }
  0x6c PF: > { %v282_v2 = vld [vmem:[%s229_s6] sm:$0xff]  ;;  %v280_v3 = vld [vmem:[%s220_s7] sm:$0xff]  ;;  %vm348_vm0 = vcmask 64512   ;;  %p1141_p7 = scmp.ne.s32.totalorder %s1641_s18, 1 }
  0x6d   : > { %284 = vxpose.xlu0.b32.start.end [1/1] (short) %v282_v2, 128  ;;  %v281_v4 = vmul.f32 0.35355338, %v280_v3  ;;  %v283_v5 = vld [vmem:[%s229_s6 + $0x8] sm:$0xff] }
  0x6e   : > { %v864_v63 = vld [vmem:[%s238_s30 + $0x8] sm:$0xff] }
  0x6f   : > { %1216 = vmatprep.subr.mxu0 %v281_v4  ;;  %929 = vmatprep.mubr.f32.mxu1 %v864_v63 }
  0x70   : > { %1217 = vmatpush3.msra.mxu0 %v281_v4 }
  0xaa   : > { %316 = vxpose.xlu0.b32.start.end [1/1] (short) %v283_v5, 128 }
  0xe9   : > { %v300_v6 = vpop.trf.xlu0 }
  0xea   : > { %1218 = vmatprep.mubr.msk.f32.mxu0 %vm348_vm0, %v300_v6 }
  0xed   : > { %v301_v7 = vpop.trf.xlu0 }
  0xee   : > { %1219 = vmatmul.mubr.msk.f32.vlgmr.msra.gmra.mxu0 %vm348_vm0, %v301_v7 }
  0xf1   : > { %v302_v8 = vpop.trf.xlu0 }
  0xf2   : > { %1221 = vmatprep.mubr.msk.f32.mxu0 %vm348_vm0, %v302_v8 }
  0xf5   : > { %v303_v9 = vpop.trf.xlu0 }
  0xf6   : > { %1222 = vmatmul.mubr.msk.f32.gmra.mxu0 %vm348_vm0, %v303_v9 }
  0xf9   : > { %v304_v10 = vpop.trf.xlu0 }
  0xfa   : > { %1224 = vmatprep.mubr.msk.f32.mxu0 %vm348_vm0, %v304_v10 }
  0xfd   : > { %v305_v11 = vpop.trf.xlu0 }
  0xfe   : > { %1225 = vmatmul.mubr.msk.f32.gmra.mxu0 %vm348_vm0, %v305_v11 }
 0x101   : > { %v306_v12 = vpop.trf.xlu0 }
 0x102   : > { %1227 = vmatprep.mubr.msk.f32.mxu0 %vm348_vm0, %v306_v12 }
 0x105   : > { %v307_v13 = vpop.trf.xlu0 }
 0x106   : > { %1228 = vmatmul.mubr.msk.f32.gmra.mxu0 %vm348_vm0, %v307_v13 }
 0x109   : > { %v308_v14 = vpop.trf.xlu0 }
 0x10a   : > { %1230 = vmatprep.mubr.msk.f32.mxu0 %vm348_vm0, %v308_v14 }
 0x10d   : > { %v309_v15 = vpop.trf.xlu0 }
 0x10e   : > { %1231 = vmatmul.mubr.msk.f32.gmra.mxu0 %vm348_vm0, %v309_v15 }
 0x111   : > { %v310_v16 = vpop.trf.xlu0 }
 0x112   : > { %1233 = vmatprep.mubr.msk.f32.mxu0 %vm348_vm0, %v310_v16 }
 0x115   : > { %v311_v17 = vpop.trf.xlu0 }
 0x116   : > { %1234 = vmatmul.mubr.msk.f32.gmra.mxu0 %vm348_vm0, %v311_v17 }
 0x119   : > { %v312_v18 = vpop.trf.xlu0 }
 0x11a   : > { %1236 = vmatprep.mubr.msk.f32.mxu0 %vm348_vm0, %v312_v18 }
 0x11d   : > { %v313_v19 = vpop.trf.xlu0 }
 0x11e   : > { %1237 = vmatmul.mubr.msk.f32.gmra.mxu0 %vm348_vm0, %v313_v19 }
 0x121   : > { %v314_v20 = vpop.trf.xlu0 }
 0x122   : > { %1239 = vmatprep.mubr.msk.f32.mxu0 %vm348_vm0, %v314_v20 }
 0x125   : > { %v315_v21 = vpop.trf.xlu0 }
 0x126   : > { %1240 = vmatmul.mubr.msk.f32.gmra.mxu0 %vm348_vm0, %v315_v21 }
 0x129   : > { %v332_v22 = vpop.trf.xlu0 }
 0x12a   : > { %1242 = vmatprep.mubr.msk.f32.mxu0 %vm348_vm0, %v332_v22 }
 0x12d   : > { %v333_v23 = vpop.trf.xlu0 }
 0x12e   : > { %1243 = vmatmul.mubr.msk.f32.gmra.mxu0 %vm348_vm0, %v333_v23 }
 0x131   : > { %v334_v24 = vpop.trf.xlu0 }
 0x132   : > { %1245 = vmatprep.mubr.msk.f32.mxu0 %vm348_vm0, %v334_v24 }
 0x135   : > { %v335_v25 = vpop.trf.xlu0 }
 0x136   : > { %1246 = vmatmul.mubr.msk.f32.gmra.mxu0 %vm348_vm0, %v335_v25 }
 0x139   : > { %v336_v26 = vpop.trf.xlu0 }
 0x13a   : > { %1248 = vmatprep.mubr.msk.f32.mxu0 %vm348_vm0, %v336_v26 }
 0x13d   : > { %v337_v27 = vpop.trf.xlu0 }
 0x13e   : > { %1249 = vmatmul.mubr.msk.f32.gmra.mxu0 %vm348_vm0, %v337_v27 }
 0x141   : > { %v338_v28 = vpop.trf.xlu0 }
 0x142   : > { %1251 = vmatprep.mubr.msk.f32.mxu0 %vm348_vm0, %v338_v28 }
 0x145   : > { %v339_v29 = vpop.trf.xlu0 }
 0x146   : > { %1252 = vmatmul.mubr.msk.f32.gmra.mxu0 %vm348_vm0, %v339_v29 }
 0x149   : > { %v340_v30 = vpop.trf.xlu0 }
 0x14a   : > { %1254 = vmatprep.mubr.msk.f32.mxu0 %vm348_vm0, %v340_v30 }
 0x14d   : > { %v341_v31 = vpop.trf.xlu0 }
 0x14e   : > { %1255 = vmatmul.mubr.msk.f32.gmra.mxu0 %vm348_vm0, %v341_v31 }
 0x151   : > { %v342_v32 = vpop.trf.xlu0 }
 0x152   : > { %1257 = vmatprep.mubr.msk.f32.mxu0 %vm348_vm0, %v342_v32 }
 0x155   : > { %v343_v33 = vpop.trf.xlu0 }
 0x156   : > { %1258 = vmatmul.mubr.msk.f32.gmra.mxu0 %vm348_vm0, %v343_v33 }
 0x159   : > { %v344_v34 = vpop.trf.xlu0 }
 0x15a   : > { %1260 = vmatprep.mubr.msk.f32.mxu0 %vm348_vm0, %v344_v34 }
 0x15d   : > { %v345_v35 = vpop.trf.xlu0 }
 0x15e   : > { %1261 = vmatmul.mubr.msk.f32.gmra.mxu0 %vm348_vm0, %v345_v35 }
 0x161   : > { %v346_v36 = vpop.trf.xlu0 }
 0x162   : > { %1263 = vmatprep.mubr.msk.f32.mxu0 %vm348_vm0, %v346_v36 }
 0x165   : > { %v347_v37 = vpop.trf.xlu0 }
 0x166   : > { %1264 = vmatmul.mubr.msk.f32.gmra.mxu0 %vm348_vm0, %v347_v37 }
 0x1ae   : > { %v1933_v38 = vpop.f32.mrf.mxu0 }
 0x1b0   : > { %v1935_v39 = vpop.f32.mrf.mxu0 }
 0x1b6   : > { %v1937_v40 = vpop.f32.mrf.mxu0 }
 0x1b8   : > { %v1939_v41 = vpop.f32.mrf.mxu0 }
 0x1be   : > { %v1941_v42 = vpop.f32.mrf.mxu0 }
 0x1bf   : > { %v672_v3 = vmax.f32 %v1933_v38, %v1941_v42 }
 0x1c0   : > { %v1943_v43 = vpop.f32.mrf.mxu0 }
 0x1c1   : > { %v671_v2 = vmax.f32 %v1935_v39, %v1943_v43 }
 0x1c6   : > { %v1945_v44 = vpop.f32.mrf.mxu0 }
 0x1c7   : > { %v674_v4 = vmax.f32 %v1937_v40, %v1945_v44 }
 0x1c8   : > { %v1947_v45 = vpop.f32.mrf.mxu0 }
 0x1c9   : > { %v673_v5 = vmax.f32 %v1939_v41, %v1947_v45 }
 0x1ce   : > { %v1949_v46 = vpop.f32.mrf.mxu0 }
 0x1cf   : > { %v676_v8 = vmax.f32 %v672_v3, %v1949_v46 }
 0x1d0   : > { %v1951_v47 = vpop.f32.mrf.mxu0 }
 0x1d1   : > { %v675_v6 = vmax.f32 %v671_v2, %v1951_v47 }
 0x1d6   : > { %v1953_v48 = vpop.f32.mrf.mxu0 }
 0x1d7   : > { %v678_v9 = vmax.f32 %v674_v4, %v1953_v48  ;;  %v713_v4 = vlaneseq }
 0x1d8   : > { %v1955_v49 = vpop.f32.mrf.mxu0 }
 0x1d9   : > { %v677_v10 = vmax.f32 %v673_v5, %v1955_v49 }
 0x1de   : > { %v1957_v50 = vpop.f32.mrf.mxu0 }
 0x1df   : > { %v680_v13 = vmax.f32 %v676_v8, %v1957_v50  ;;  %v714_v8 = vshrl.u32 %v713_v4, 7 }
 0x1e0   : > { %v1959_v51 = vpop.f32.mrf.mxu0 }
 0x1e1   : > { %v679_v11 = vmax.f32 %v675_v6, %v1959_v51 }
 0x1e6   : > { %v1961_v52 = vpop.f32.mrf.mxu0 }
 0x1e7   : > { %v682_v14 = vmax.f32 %v678_v9, %v1961_v52  ;;  %v670_v9 = vld [vmem:[#allocation2] sm:$0x1] }
 0x1e8   : > { %v1963_v53 = vpop.f32.mrf.mxu0 }
 0x1e9   : > { %v681_v15 = vmax.f32 %v677_v10, %v1963_v53 }
 0x1ee   : > { %v1965_v54 = vpop.f32.mrf.mxu0 }
 0x1ef   : > { %v684_v17 = vmax.f32 %v680_v13, %v1965_v54  ;;  %v2031_v13 = vsub.s32 0, %v714_v8 }
 0x1f0   : > { %v1967_v55 = vpop.f32.mrf.mxu0 }
 0x1f1   : > { %v683_v16 = vmax.f32 %v679_v11, %v1967_v55 }
 0x1f6   : > { %v1969_v56 = vpop.f32.mrf.mxu0 }
 0x1f7   : > { %v686_v18 = vmax.f32 %v682_v14, %v1969_v56 }
 0x1f8   : > { %v1971_v57 = vpop.f32.mrf.mxu0 }
 0x1f9   : > { %v685_v19 = vmax.f32 %v681_v15, %v1971_v57 }
 0x1fe   : > { %v1973_v58 = vpop.f32.mrf.mxu0 }
 0x1ff   : > { %v688_v22 = vmax.f32 %v684_v17, %v1973_v58 }
 0x200   : > { %v1975_v59 = vpop.f32.mrf.mxu0 }
 0x201   : > { %v687_v20 = vmax.f32 %v683_v16, %v1975_v59 }
 0x206   : > { %v1977_v60 = vpop.f32.mrf.mxu0 }
 0x207   : > { %v690_v23 = vmax.f32 %v686_v18, %v1977_v60 }
 0x208   : > { %v1979_v61 = vpop.f32.mrf.mxu0 }
 0x209   : > { %v689_v24 = vmax.f32 %v685_v19, %v1979_v61 }
 0x20e   : > { %v1981_v62 = vpop.f32.mrf.mxu0 }
 0x20f   : > { %v692_v27 = vmax.f32 %v688_v22, %v1981_v62 }
 0x210   : > { %v1985_v0 = vpop.f32.mrf.mxu0 }
 0x211   : > { %v691_v25 = vmax.f32 %v687_v20, %v1985_v0 }
 0x216   : > { %v1987_v1 = vpop.f32.mrf.mxu0 }
 0x217   : > { %v694_v28 = vmax.f32 %v690_v23, %v1987_v1 }
 0x218   : > { %v1998_v7 = vpop.f32.mrf.mxu0 }
 0x219   : > { %v693_v29 = vmax.f32 %v689_v24, %v1998_v7 }
 0x21e   : > { %v2004_v12 = vpop.f32.mrf.mxu0 }
 0x21f   : > { %v696_v32 = vmax.f32 %v692_v27, %v2004_v12 }
 0x220   : > { %v2014_v21 = vpop.f32.mrf.mxu0 }
 0x221   : > { %v695_v30 = vmax.f32 %v691_v25, %v2014_v21 }
 0x223   : > { %v699_v35 = vmax.f32 %v695_v30, %v696_v32 }
 0x226   : > { %v2020_v26 = vpop.f32.mrf.mxu0 }
 0x227   : > { %v698_v33 = vmax.f32 %v694_v28, %v2020_v26 }
 0x228   : > { %v2026_v31 = vpop.f32.mrf.mxu0 }
 0x229   : > { %v697_v34 = vmax.f32 %v693_v29, %v2026_v31 }
 0x22b   : > { %v700_v36 = vmax.f32 %v697_v34, %v698_v33 }
 0x22d   : > { %v701_v37 = vmax.f32 %v699_v35, %v700_v36 }
 0x22f   : > { %v702_v63 = vrot.slane %v701_v37, 4 }
 0x231   : > { %v703_v2 = vmax.f32 %v701_v37, %v702_v63 }
 0x233   : > { %v704_v3 = vrot.slane %v703_v2, 2 }
 0x235   : > { %v705_v5 = vmax.f32 %v703_v2, %v704_v3 }
 0x237   : > { %v706_v6 = vrot.slane %v705_v5, 1 }
 0x239   : > { %v707_v10 = vmax.f32 %v705_v5, %v706_v6 }
 0x23b   : > { %v708_v11 = vmax.f32 %v670_v9, %v707_v10 }
 0x23d   : > { %v709_v14 = vsub.f32 %v670_v9, %v708_v11  ;;  %937 = vst [vmem:[#allocation2] sm:$0x1] %v708_v11  ;;  %v2034_v16 = vrot.slane %v708_v11, %v2031_v13 }
 0x23f   : > { %v710_v15 = vmul.f32 1.442695, %v709_v14  ;;  %v718_v17 = vsub.f32 %v1935_v39, %v2034_v16  ;;  %v719_v18 = vsub.f32 %v1933_v38, %v2034_v16  ;;  %v720_v19 = vsub.f32 %v1939_v41, %v2034_v16 }
 0x240   : > { %v721_v20 = vsub.f32 %v1937_v40, %v2034_v16  ;;  %v722_v24 = vsub.f32 %v1943_v43, %v2034_v16  ;;  %v723_v27 = vsub.f32 %v1941_v42, %v2034_v16  ;;  %v724_v38 = vsub.f32 %v1947_v45, %v2034_v16 }
 0x241   : > { %1381 = vpow2.f32 %v710_v15  ;;  %v750_v22 = vmul.f32 1.442695, %v718_v17  ;;  %v752_v23 = vmul.f32 1.442695, %v719_v18  ;;  %v754_v25 = vmul.f32 1.442695, %v720_v19 }
 0x242   : > { %v756_v39 = vmul.f32 1.442695, %v721_v20  ;;  %v758_v41 = vmul.f32 1.442695, %v722_v24  ;;  %v725_v40 = vsub.f32 %v1945_v44, %v2034_v16  ;;  %v760_v28 = vmul.f32 1.442695, %v723_v27 }
 0x243   : > { %1383 = vpow2.f32 %v750_v22  ;;  %v726_v43 = vsub.f32 %v1951_v47, %v2034_v16  ;;  %v762_v30 = vmul.f32 1.442695, %v724_v38  ;;  %v727_v42 = vsub.f32 %v1949_v46, %v2034_v16 }
 0x244   : > { %1385 = vpow2.f32 %v752_v23  ;;  %v764_v32 = vmul.f32 1.442695, %v725_v40  ;;  %v728_v44 = vsub.f32 %v1955_v49, %v2034_v16  ;;  %v729_v47 = vsub.f32 %v1953_v48, %v2034_v16 }
 0x245   : > { %1387 = vpow2.f32 %v754_v25  ;;  %v766_v33 = vmul.f32 1.442695, %v726_v43  ;;  %v768_v35 = vmul.f32 1.442695, %v727_v42  ;;  %v730_v46 = vsub.f32 %v1959_v51, %v2034_v16 }
 0x246   : > { %1389 = vpow2.f32 %v756_v39  ;;  %v770_v37 = vmul.f32 1.442695, %v728_v44  ;;  %v731_v2 = vsub.f32 %v1957_v50, %v2034_v16  ;;  %v772_v3 = vmul.f32 1.442695, %v729_v47 }
 0x247   : > { %1391 = vpow2.f32 %v758_v41  ;;  %v732_v5 = vsub.f32 %v1963_v53, %v2034_v16  ;;  %v774_v51 = vmul.f32 1.442695, %v730_v46  ;;  %v733_v9 = vsub.f32 %v1961_v52, %v2034_v16 }
 0x248   : > { %1393 = vpow2.f32 %v760_v28  ;;  %v776_v50 = vmul.f32 1.442695, %v731_v2  ;;  %v734_v14 = vsub.f32 %v1967_v55, %v2034_v16  ;;  %v749_v53 = vsub.f32 %v2020_v26, %v2034_v16 }
 0x249   : > { %1395 = vpow2.f32 %v762_v30  ;;  %v778_v15 = vmul.f32 1.442695, %v732_v5  ;;  %v735_v52 = vsub.f32 %v1965_v54, %v2034_v16  ;;  %v748_v19 = vsub.f32 %v2026_v31, %v2034_v16 }
 0x24a   : > { %1397 = vpow2.f32 %v764_v32  ;;  %v780_v20 = vmul.f32 1.442695, %v733_v9  ;;  %v736_v26 = vsub.f32 %v1971_v57, %v2034_v16  ;;  %v782_v23 = vmul.f32 1.442695, %v734_v14 }
 0x24b   : > { %1399 = vpow2.f32 %v766_v33  ;;  %v747_v24 = vsub.f32 %v2004_v12, %v2034_v16  ;;  %v812_v25 = vmul.f32 1.442695, %v749_v53  ;;  %v737_v31 = vsub.f32 %v1969_v56, %v2034_v16 }
 0x24c   : > { %1401 = vpow2.f32 %v768_v35  ;;  %v784_v39 = vmul.f32 1.442695, %v735_v52  ;;  %v746_v38 = vsub.f32 %v2014_v21, %v2034_v16  ;;  %v810_v41 = vmul.f32 1.442695, %v748_v19 }
 0x24d   : > { %1403 = vpow2.f32 %v770_v37  ;;  %v738_v12 = vsub.f32 %v1975_v59, %v2034_v16  ;;  %v786_v28 = vmul.f32 1.442695, %v736_v26  ;;  %v745_v43 = vsub.f32 %v1987_v1, %v2034_v16 }
 0x24e   : > { %v2052_v29 = vpop.eup %1381  ;;  %1405 = vpow2.f32 %v772_v3  ;;  %v808_v30 = vmul.f32 1.442695, %v747_v24  ;;  %v739_v21 = vsub.f32 %v1973_v58, %v2034_v16  ;;  %v788_v32 = vmul.f32 1.442695, %v737_v31 }
 0x24f   : > { %v860_v45 = vrot.slane %v2052_v29, %v2031_v13  ;;  %1407 = vpow2.f32 %v774_v51  ;;  %v744_v44 = vsub.f32 %v1998_v7, %v2034_v16  ;;  %v806_v59 = vmul.f32 1.442695, %v746_v38 }
 0x250   : > { %v2062_v34 = vpop.eup %1383  ;;  %1409 = vpow2.f32 %v776_v50  ;;  %v740_v1 = vsub.f32 %v1979_v61, %v2034_v16  ;;  %v790_v35 = vmul.f32 1.442695, %v738_v12  ;;  %v743_v46 = vsub.f32 %v1981_v62, %v2034_v16 }
 0x251   : > { %v2066_v36 = vpop.eup %1385  ;;  %1411 = vpow2.f32 %v778_v15  ;;  %v804_v37 = vmul.f32 1.442695, %v745_v43  ;;  %v741_v7 = vsub.f32 %v1977_v60, %v2034_v16  ;;  %v792_v2 = vmul.f32 1.442695, %v739_v21 }
 0x252   : > { %v816_v63 = vadd.f32 %v2066_v36, %v2062_v34  ;;  %v2072_v49 = vpop.eup %1387  ;;  %1413 = vpow2.f32 %v780_v20  ;;  %v742_v3 = vsub.f32 %v1985_v0, %v2034_v16  ;;  %v794_v51 = vmul.f32 1.442695, %v740_v1  ;;  %v814_v1 = vld [vmem:[#allocation3] sm:$0x1] }
 0x253   : > { %v2077_v4 = vpop.eup %1389  ;;  %1415 = vpow2.f32 %v782_v23  ;;  %v796_v50 = vmul.f32 1.442695, %v741_v7 }
 0x254   : > { %v817_v48 = vadd.f32 %v2072_v49, %v816_v63  ;;  %v2082_v8 = vpop.eup %1391  ;;  %1417 = vpow2.f32 %v812_v25 }
 0x255   : > { %v2087_v11 = vpop.eup %1393  ;;  %1419 = vpow2.f32 %v784_v39 }
 0x256   : > { %v818_v6 = vadd.f32 %v2077_v4, %v817_v48  ;;  %v2094_v18 = vpop.eup %1395  ;;  %1421 = vpow2.f32 %v810_v41  ;;  %v802_v48 = vmul.f32 1.442695, %v744_v44 }
 0x257   : > { %v2101_v55 = vpop.eup %1397  ;;  %1423 = vpow2.f32 %v786_v28 }
 0x258   : > { %v819_v10 = vadd.f32 %v2082_v8, %v818_v6  ;;  %v2108_v27 = vpop.eup %1399  ;;  %1425 = vpow2.f32 %v808_v30  ;;  %v800_v6 = vmul.f32 1.442695, %v743_v46 }
 0x259   : > { %v2115_v40 = vpop.eup %1401  ;;  %1427 = vpow2.f32 %v788_v32 }
 0x25a   : > { %v820_v17 = vadd.f32 %v2087_v11, %v819_v10  ;;  %v2122_v42 = vpop.eup %1403  ;;  %1429 = vpow2.f32 %v806_v59  ;;  %v798_v10 = vmul.f32 1.442695, %v742_v3 }
 0x25b   : > { %v1406_v47 = vpop.eup %1405  ;;  %1431 = vpow2.f32 %v790_v35 }
 0x25c   : > { %v821_v22 = vadd.f32 %v2094_v18, %v820_v17  ;;  %v1408_v63 = vpop.eup %1407  ;;  %1433 = vpow2.f32 %v804_v37 }
 0x25d   : > { %v1410_v5 = vpop.eup %1409  ;;  %1435 = vpow2.f32 %v792_v2 }
 0x25e   : > { %v822_v54 = vadd.f32 %v2101_v55, %v821_v22  ;;  %v1412_v9 = vpop.eup %1411  ;;  %1437 = vpow2.f32 %v802_v48 }
 0x25f   : > { %v1414_v14 = vpop.eup %1413  ;;  %1439 = vpow2.f32 %v794_v51 }
 0x260   : > { %v823_v57 = vadd.f32 %v2108_v27, %v822_v54  ;;  %v2137_v53 = vpop.eup %1415  ;;  %1441 = vpow2.f32 %v800_v6 }
 0x261   : > { %v2139_v16 = vpop.eup %1417  ;;  %1443 = vpow2.f32 %v796_v50 }
 0x262   : > { %v824_v56 = vadd.f32 %v2115_v40, %v823_v57  ;;  %v1420_v15 = vpop.eup %1419  ;;  %1445 = vpow2.f32 %v798_v10  ;;  %1181 = vmatprep.subr.mxu1 %v2139_v16 }
 0x263   : > { %v1422_v52 = vpop.eup %1421  ;;  %1182 = vmatpush3.msra.mxu1 %v1414_v14 }
 0x264   : > { %v825_v33 = vadd.f32 %v2122_v42, %v824_v56  ;;  %v1424_v19 = vpop.eup %1423  ;;  %1183 = vmatprep.subr.mxu1 %v1422_v52 }
 0x265   : > { %v1426_v22 = vpop.eup %1425  ;;  %1184 = vmatpush3.msra.mxu1 %v1412_v9 }
 0x266   : > { %v826_v58 = vadd.f32 %v1406_v47, %v825_v33  ;;  %v1428_v26 = vpop.eup %1427  ;;  %1185 = vmatprep.subr.mxu1 %v1426_v22 }
 0x267   : > { %v1430_v24 = vpop.eup %1429  ;;  %1186 = vmatpush3.msra.mxu1 %v1410_v5 }
 0x268   : > { %v827_v61 = vadd.f32 %v1408_v63, %v826_v58  ;;  %v1432_v25 = vpop.eup %1431  ;;  %1187 = vmatprep.subr.mxu1 %v1430_v24  ;;  %v855_v58 = vld [vmem:[#allocation4] sm:$0xff] }
 0x269   : > { %v1434_v31 = vpop.eup %1433  ;;  %1188 = vmatpush3.msra.mxu1 %v1408_v63  ;;  %v862_v7 = vmul.f32 %v860_v45, %v855_v58 }
 0x26a   : > { %v828_v62 = vadd.f32 %v1410_v5, %v827_v61  ;;  %v1436_v39 = vpop.eup %1435  ;;  %1189 = vmatprep.subr.mxu1 %v1434_v31 }
 0x26b   : > { %v1438_v41 = vpop.eup %1437  ;;  %1190 = vmatpush3.msra.mxu1 %v1406_v47 }
 0x26c   : > { %v829_v60 = vadd.f32 %v1412_v9, %v828_v62  ;;  %v1440_v57 = vpop.eup %1439  ;;  %1191 = vmatprep.subr.mxu1 %v1438_v41 }
 0x26d   : > { %v1442_v28 = vpop.eup %1441  ;;  %1192 = vmatpush3.msra.mxu1 %v2122_v42 }
 0x26e   : > { %v830_v0 = vadd.f32 %v1414_v14, %v829_v60  ;;  %v1444_v43 = vpop.eup %1443  ;;  %1193 = vmatprep.subr.mxu1 %v1442_v28 }
 0x26f   : > { %v1446_v56 = vpop.eup %1445  ;;  %1194 = vmatpush3.msra.mxu1 %v2115_v40 }
 0x270   : > { %v831_v17 = vadd.f32 %v2137_v53, %v830_v0  ;;  %1195 = vmatprep.subr.mxu1 %v1446_v56 }
 0x271   : > { %1196 = vmatpush3.msra.mxu1 %v2108_v27 }
 0x272   : > { %v832_v20 = vadd.f32 %v1420_v15, %v831_v17  ;;  %1197 = vmatprep.subr.mxu1 %v1444_v43 }
 0x273   : > { %1198 = vmatpush3.msra.mxu1 %v2101_v55 }
 0x274   : > { %v833_v23 = vadd.f32 %v1424_v19, %v832_v20  ;;  %1199 = vmatprep.subr.mxu1 %v1440_v57 }
 0x275   : > { %1200 = vmatpush3.msra.mxu1 %v2094_v18  ;;  %v863_v18 = vld [vmem:[%s238_s30] sm:$0xff] }
 0x276   : > { %v834_v54 = vadd.f32 %v1428_v26, %v833_v23  ;;  %1201 = vmatprep.subr.mxu1 %v1436_v39 }
 0x277   : > { %1202 = vmatpush3.msra.mxu1 %v2087_v11 }
 0x278   : > { %v835_v38 = vadd.f32 %v1432_v25, %v834_v54  ;;  %1203 = vmatprep.subr.mxu1 %v1432_v25 }
 0x279   : > { %1204 = vmatpush3.msra.mxu1 %v2082_v8 }
 0x27a   : > { %v836_v12 = vadd.f32 %v1436_v39, %v835_v38  ;;  %1205 = vmatprep.subr.mxu1 %v1428_v26 }
 0x27b   : > { %1206 = vmatpush3.msra.mxu1 %v2077_v4 }
 0x27c   : > { %v837_v30 = vadd.f32 %v1440_v57, %v836_v12  ;;  %1207 = vmatprep.subr.mxu1 %v1424_v19 }
 0x27d   : > { %1208 = vmatpush3.msra.mxu1 %v2072_v49  ;;  %v815_v49 = vmul.f32 %v2052_v29, %v814_v1 }
 0x27e   : > { %v838_v21 = vadd.f32 %v1444_v43, %v837_v30  ;;  %1209 = vmatprep.subr.mxu1 %v1420_v15 }
 0x27f   : > { %1210 = vmatpush3.msra.mxu1 %v2066_v36 }
 0x280   : > { %v839_v32 = vadd.f32 %v1446_v56, %v838_v21  ;;  %1211 = vmatprep.subr.mxu1 %v2137_v53 }
 0x281   : > { %1212 = vmatpush3.msra.mxu1 %v2062_v34 }
 0x282   : > { %v840_v44 = vadd.f32 %v1442_v28, %v839_v32  ;;  %930 = vmatmul.mubr.f32.vlgmr.msra.gmra.mxu1 %v863_v18 }
 0x284   : > { %v841_v42 = vadd.f32 %v1438_v41, %v840_v44 }
 0x286   : > { %v842_v59 = vadd.f32 %v1434_v31, %v841_v42 }
 0x288   : > { %v843_v40 = vadd.f32 %v1430_v24, %v842_v59 }
 0x28a   : > { %v844_v27 = vadd.f32 %v1426_v22, %v843_v40 }
 0x28c   : > { %v845_v55 = vadd.f32 %v1422_v52, %v844_v27 }
 0x28e   : > { %v846_v11 = vadd.f32 %v2139_v16, %v845_v55 }
 0x290   : > { %v847_v8 = vrot.slane %v846_v11, 4 }
 0x292   : > { %v848_v33 = vadd.f32 %v847_v8, %v846_v11 }
 0x294   : > { %v849_v4 = vrot.slane %v848_v33, 2 }
 0x296   : > { %v850_v47 = vadd.f32 %v849_v4, %v848_v33 }
 0x298   : > { %v851_v35 = vrot.slane %v850_v47, 1 }
 0x29a   : > { %v852_v46 = vadd.f32 %v851_v35, %v850_v47 }
 0x29c   : > { %v853_v37 = vadd.f32 %v852_v46, %v815_v49 }
 0x29e   : > { %854 = vst [vmem:[#allocation3] sm:$0x1] %v853_v37 }
 0x342   : > { %v1213_v36 = vpop.f32.mrf.mxu1 }
 0x344   : > { %v1214_v63 = vpop.f32.mrf.mxu1 }
 0x345   : > { %v1215_v34 = vadd.f32 %v1214_v63, %v1213_v36  ;;  %941 = sbr.rel (%p1141_p7) target bundleno = 862 (0x35e), region = 52 }
 0x347   : > { %v935_v2 = vadd.f32 %v1215_v34, %v862_v7 }
 0x349   : > { %936 = vst [vmem:[#allocation4] sm:$0xff] %v935_v2 }
 0x34a   : > { %v942_v3 = vld [vmem:[#allocation3] sm:$0x1] }
 0x34b   : > { %1447 = vrcp.f32 %v942_v3 }
 0x350   : > { %v944_v61 = vld [vmem:[#allocation4] sm:$0xff] }
 0x358   : > { %v1448_v48 = vpop.eup %1447 }
 0x359   : > { %v949_v5 = vrot.slane %v1448_v48, %v2031_v13 }
 0x35b   : > { %v951_v51 = vmul.f32 %v949_v5, %v944_v61 }
 0x35d   : > { %952 = vst [vmem:[%s1898_s27] sm:$0xff] %v951_v51 }
 0x35e PF: > { %s2258_s23 = sld [smem:[#allocation17_spill]]  ;;  %s967_s3 = sshll.u32 %s1898_s27, 4  ;;  %s968_s3 = int_to_ptr.vmem [resolvable:$true] %s967_s3 }
 0x35f   : > { %s2259_s2 = sld [smem:[#allocation25_spill]]  ;;  %s954_s14 = scalar_lea.sflag [#allocation7], %s1880_s15 }
 0x360   : > { %s1533_s20 = scalar_lea.vmem %s968_s3, 128  ;;  %p2260_p6 = scmp.ne.s32.totalorder %s2253_s11, 0 }
 0x361   : > { %p1534_p12 = scmp.ne.s32.totalorder %s968_s3, %s1533_s20  ;;  %s1664_s29 = smov [#allocation11]  }
 0x362   : > { %s1537_s5 = sshll.u32 %s1664_s29, 4  ;;  %s1538_s5 = int_to_ptr.vmem [resolvable:$false] %s1537_s5 }
 0x363   : > { %p1535_p0 = pnand %p1534_p12, %p2260_p6  ;;  %s1539_s21 = scalar_lea.vmem %s1538_s5, 256 }
 0x364   : > { %s1143_s28 = sshll.u32 %s2258_s23, 7  ;;  %p1540_p2 = scmp.lt.s32.totalorder %s968_s3, %s1538_s5 }
 0x365   : > { %s965_s18 = scalar_lea.hbm %s2259_s2, %s1143_s28  ;;  %p1536_p13 = pneg %p1535_p0 }
 0x366   : > { %p1541_p3 = scmp.lt.s32.totalorder %s1539_s21, %s1533_s20 }
 0x368   : > { %p1542_p4 = por %p1541_p3, %p1540_p2 }
 0x36a   : > { %p1543_p10 = pnand %p1542_p4, %p1536_p13 }
 0x36c   : > { %1546 = shalt.err (!%p1543_p10)
}
 0x36d   : > { %s1547_s19 = scalar_lea.hbm %s965_s18, 128  ;;  %s1551_s7 = scalar_lea.hbm %s2259_s2, 512 }
 0x36e   : > { %p1548_p5 = scmp.ne.s32.totalorder %s965_s18, %s1547_s19  ;;  %p1552_p8 = scmp.lt.s32.totalorder %s965_s18, %s2259_s2 }
 0x36f   : > { %p1553_p9 = scmp.lt.s32.totalorder %s1551_s7, %s1547_s19 }
 0x370   : > { %p1549_p1 = pnand %p1548_p5, %p2260_p6 }
 0x371   : > { %p1554_p7 = por %p1553_p9, %p1552_p8 }
 0x372   : > { %p1550_p11 = pneg %p1549_p1 }
 0x374   : > { %p1555_p12 = pnand %p1554_p7, %p1550_p11 }
 0x376   : > { %1558 = shalt.err (!%p1555_p12)
}
 0x377   : > { %1272 = dma.vmem_to_hbm [thread:$0]  (%p2260_p6), %s968_s3, 128, %s965_s18, %s954_s14  }
 0x378 PF: > { %s2261_s4 = sld [smem:[#allocation16_spill]]  ;;  %p1289_p0 = scmp.ge.s32.totalorder %s1657_s22, 2 }
 0x379   : > { %p2262_p13 = scmp.ne.s32.totalorder %s2254_s8, 0 }
 0x37b   : > { %p1285_p2 = pnand %p1289_p0, %p2262_p13 }
 0x37d   : > { %p1286_p3 = pneg %p1285_p2 }
 0x37e   : > { %s979_s1 = sand.u32 1, %s2261_s4  }
 0x37f   : > { %s980_s6 = scalar_lea.sflag [#allocation7], %s979_s1 }
 0x380   : > { %1612 = dma.done.wait (%p1286_p3), %s980_s6, 128  }
 0x381   : > { %1614 = vsyncadd (%p1286_p3), %s980_s6, 4294967168  ;;  %s22_s22 = sadd.s32 1, %s1657_s22   ;;  %s2263_s30 = sld [smem:[#allocation15_spill]] }
 0x382   : > { %p19_p4 = scmp.ge.s32.totalorder %s22_s22, 10   ;;  %s2264_s14 = sld [smem:[#allocation21_spill]] }
 0x383   : > { %s2265_s18 = sld [smem:[#allocation18_spill]]  ;;  %s2269_s12 = smov %s1621_s13 }
 0x384   : > { %s2266_s19 = sld [smem:[#allocation19_spill]]  ;;  %s2271_s15 = smov %s1633_s16 }
 0x385   : > { %s2267_s20 = sld [smem:[#allocation20_spill]]  ;;  %s2272_s16 = smov %s1637_s17 }
 0x386   : > { %s2268_s21 = sld [smem:[#allocation22_spill]]  ;;  %s2273_s17 = smov %s1845_s10 }
 0x387   : > { %s2270_s13 = smov %s2263_s30  ;;  %21 = sbr.rel (!%p19_p4) target bundleno = 15 (0xf), region = 109 }
 0x38c   :  { %985 = vsyncpa [#allocation6], 1 }
 0x38d   :  { %987 = vsyncpa [#allocation6 + $0x1], 1 }
 0x38e   :  { %988 = vsyncpa [#allocation9], 1 }
 0x38f   :  { %990 = vsyncpa [#allocation9 + $0x1], 1 }
 0x390   :  { %991 = vsyncpa [#allocation7], 1 }
 0x391   :  { %993 = vsyncpa [#allocation7 + $0x1], 1 }

</bundles_post_ra>
